<compile_context>
chip_gen: v7x
topology: tpu7x:2x2x1
jax: 0.10.0
libtpu: 0.0.40
codegen_flags: <defaults>
</compile_context>

<pallas_src>
import jax
import jax.numpy as jnp
from jax.experimental import pallas as pl
from jax.experimental.pallas import tpu as pltpu


# ----------------------------------------------------------------------------
# Shared in-kernel butterfly:  2x2 block [a b; c d] -> LL, LH, HL, HH (x 0.5)
# ----------------------------------------------------------------------------
def _butterfly_store(a, b, c, d, o_ref):
    # a, b, c, d: (TC, TH, Wo) float32 phase planes
    # o_ref:      (TC, 4, TH, Wo) output block, subband order [LL, LH, HL, HH]
    out_dt = o_ref.dtype
    s0 = a + b          # row 2i   pair sum
    s1 = c + d          # row 2i+1 pair sum
    o_ref[:, 0, :, :] = (0.5 * (s0 + s1)).astype(out_dt)   # LL
    o_ref[:, 1, :, :] = (0.5 * (s0 - s1)).astype(out_dt)   # LH
    d0 = a - b
    d1 = c - d
    o_ref[:, 2, :, :] = (0.5 * (d0 + d1)).astype(out_dt)   # HL
    o_ref[:, 3, :, :] = (0.5 * (d0 - d1)).astype(out_dt)   # HH


def _dwt_fused_kernel(x_ref, o_ref):
    # Fused path: x_ref holds raw image rows (TC, 2*TH, W); phases are
    # extracted with stride-2 ref loads (sublane stride for rows, lane stride
    # for columns). o_ref: (TC, 4, TH, Wo).
    th = x_ref.shape[1] // 2
    wo = x_ref.shape[2] // 2
    a = x_ref[:, pl.ds(0, th, stride=2), pl.ds(0, wo, stride=2)].astype(jnp.float32)
    b = x_ref[:, pl.ds(0, th, stride=2), pl.ds(1, wo, stride=2)].astype(jnp.float32)
    c = x_ref[:, pl.ds(1, th, stride=2), pl.ds(0, wo, stride=2)].astype(jnp.float32)
    d = x_ref[:, pl.ds(1, th, stride=2), pl.ds(1, wo, stride=2)].astype(jnp.float32)
    _butterfly_store(a, b, c, d, o_ref)


def _dwt_phase_kernel(x_ref, o_ref):
    # Fallback path: phases already deinterleaved by the wrapper.
    # x_ref: (TC, 4, TH, Wo) phase planes [a, b, c, d]; o_ref: (TC, 4, TH, Wo).
    a = x_ref[:, 0, :, :].astype(jnp.float32)
    b = x_ref[:, 1, :, :].astype(jnp.float32)
    c = x_ref[:, 2, :, :].astype(jnp.float32)
    d = x_ref[:, 3, :, :].astype(jnp.float32)
    _butterfly_store(a, b, c, d, o_ref)


# ----------------------------------------------------------------------------
# Tiling / pallas_call wrappers
# ----------------------------------------------------------------------------
_BLOCK_BUDGET = 4 * 1024 * 1024   # target bytes per (input or output) block


def _pick_tiles(C, Ho, W, itemsize):
    """Pick channel tile TC and output-row tile TH.

    Keeps each input block (TC * 2*TH * W elems) and output block (same count)
    at <= _BLOCK_BUDGET bytes so the double-buffered working set stays well
    under the scoped-VMEM limit on all TPU generations. TH is a multiple of 8
    (sublane tiling) or equals Ho; TC divides C.
    """
    min_rows_bytes = 2 * 8 * W * itemsize            # block bytes at TH=8, TC=1
    max_tc = max(1, _BLOCK_BUDGET // max(1, min_rows_bytes))
    tc = 1
    for t in range(min(C, max_tc), 0, -1):
        if C % t == 0:
            tc = t
            break
    max_th = max(1, _BLOCK_BUDGET // max(1, tc * 2 * W * itemsize))
    if Ho <= max_th:
        th = Ho
    else:
        th = Ho                                      # fallback: full height
        for t in range(min(Ho, max_th), 0, -1):
            if Ho % t == 0 and t % 8 == 0:
                th = t
                break
    return tc, th


def _compiler_params():
    return pltpu.CompilerParams(
        dimension_semantics=("parallel", "parallel", "parallel"),
        vmem_limit_bytes=32 * 1024 * 1024,
    )


def _dwt_fused(x, tc, th):
    B, C, H, W = x.shape
    Ho, Wo = H // 2, W // 2
    return pl.pallas_call(
        _dwt_fused_kernel,
        out_shape=jax.ShapeDtypeStruct((B, C, 4, Ho, Wo), x.dtype),
        grid=(B, C // tc, Ho // th),
        in_specs=[
            pl.BlockSpec((None, tc, 2 * th, W), lambda b, ci, hi: (b, ci, hi, 0)),
        ],
        out_specs=pl.BlockSpec((None, tc, 4, th, Wo),
                               lambda b, ci, hi: (b, ci, 0, hi, 0)),
        compiler_params=_compiler_params(),
    )(x)


def _dwt_phases(x, tc, th):
    B, C, H, W = x.shape
    Ho, Wo = H // 2, W // 2
    # Wrapper-side deinterleave of the 2x2 spatial phases (one extra XLA pass).
    xp = (x.reshape(B, C, Ho, 2, Wo, 2)
           .transpose(0, 1, 3, 5, 2, 4)
           .reshape(B, C, 4, Ho, Wo))
    return pl.pallas_call(
        _dwt_phase_kernel,
        out_shape=jax.ShapeDtypeStruct((B, C, 4, Ho, Wo), x.dtype),
        grid=(B, C // tc, Ho // th),
        in_specs=[
            pl.BlockSpec((None, tc, 4, th, Wo), lambda b, ci, hi: (b, ci, 0, hi, 0)),
        ],
        out_specs=pl.BlockSpec((None, tc, 4, th, Wo),
                               lambda b, ci, hi: (b, ci, 0, hi, 0)),
        compiler_params=_compiler_params(),
    )(xp)


def _dwt_jnp(x):
    """Cheap pure-JAX reference (same math); used only to gate the fused path."""
    B, C, H, W = x.shape
    Ho, Wo = H // 2, W // 2
    xr = x.astype(jnp.float32).reshape(B, C, Ho, 2, Wo, 2)
    a = xr[:, :, :, 0, :, 0]
    b = xr[:, :, :, 0, :, 1]
    c = xr[:, :, :, 1, :, 0]
    d = xr[:, :, :, 1, :, 1]
    s0, s1, d0, d1 = a + b, c + d, a - b, c - d
    y = jnp.stack([0.5 * (s0 + s1), 0.5 * (s0 - s1),
                   0.5 * (d0 + d1), 0.5 * (d0 - d1)], axis=2)
    return y.reshape(B, 4 * C, Ho, Wo).astype(x.dtype)


_FUSED_STATE = {"ok": None}   # None: untested, True: use fused, False: fall back


def dwt_forward(x):
    """x: (B, C, H, W) -> (B, 4*C, H//2, W//2), J=1 Haar DWT (stride-2, VALID)."""
    B, C, H, W = x.shape
    assert H % 2 == 0 and W % 2 == 0, "spatial dims must be even"
    Ho, Wo = H // 2, W // 2
    tc, th = _pick_tiles(C, Ho, W, jnp.dtype(x.dtype).itemsize)

    if _FUSED_STATE["ok"] is not False:
        try:
            y = _dwt_fused(x, tc, th).reshape(B, 4 * C, Ho, Wo)
            if _FUSED_STATE["ok"] is None:
                # One-time sanity check of the strided-load path; a wrong/absent
                # strided lowering gives grossly different values or raises.
                ok = bool(jnp.allclose(y.astype(jnp.float32),
                                       _dwt_jnp(x).astype(jnp.float32),
                                       rtol=1e-2, atol=1e-2))
                _FUSED_STATE["ok"] = ok
                if not ok:
                    raise ValueError("fused DWT kernel mismatch; falling back")
            return y
        except Exception:
            # Strided lane/sublane ref loads unavailable in this Mosaic build:
            # use the (still tiled / parallel / slice-stored) unfused path.
            _FUSED_STATE["ok"] = False

    return _dwt_phases(x, tc, th).reshape(B, 4 * C, Ho, Wo)


def dwt_ref(x):
    """Pure-JAX reference reproducing the PyTorch module exactly."""
    ll = jnp.array([[0.5, 0.5], [0.5, 0.5]], dtype=x.dtype)
    lh = jnp.array([[-0.5, -0.5], [0.5, 0.5]], dtype=x.dtype)
    hl = jnp.array([[-0.5, 0.5], [-0.5, 0.5]], dtype=x.dtype)
    hh = jnp.array([[0.5, -0.5], [-0.5, 0.5]], dtype=x.dtype)
    filts = jnp.stack([f[None, ::-1, ::-1] for f in (ll, lh, hl, hh)], axis=0)  # (4,1,2,2)
    C = x.shape[1]
    w = jnp.concatenate([filts] * C, axis=0)  # (4C, 1, 2, 2)
    return jax.lax.conv_general_dilated(
        x, w, window_strides=(2, 2), padding="VALID",
        dimension_numbers=("NCHW", "OIHW", "NCHW"),
        feature_group_count=C)


if __name__ == "__main__":
    key = jax.random.PRNGKey(0)
    x = jax.random.normal(key, (2, 4, 16, 16), dtype=jnp.float32)

    y = dwt_forward(x)
    jax.block_until_ready(y)

    y_ref = dwt_ref(x)
    assert y.shape == (2, 16, 8, 8), y.shape
    assert y.dtype == jnp.float32
    assert jnp.allclose(y, y_ref, atol=1e-5, rtol=1e-5), float(jnp.abs(y - y_ref).max())

    print("KERNEL_OK")
</pallas_src>

<mosaic_0001>
module attributes {stable_mosaic.version = 11 : i64} {
  func.func @_dwt_fused_kernel(%arg0: i32, %arg1: i32, %arg2: i32, %arg3: memref<1x4x16x16xf32, #tpu.memory_space<vmem>>, %arg4: memref<1x4x4x8x8xf32, #tpu.memory_space<vmem>>) attributes {dimension_semantics = [#tpu.dimension_semantics<parallel>, #tpu.dimension_semantics<parallel>, #tpu.dimension_semantics<parallel>], iteration_bounds = array<i64: 2, 1, 1>, scalar_prefetch = 0 : i64, scratch_operands = 0 : i64, tpu.core_type = #tpu.core_type<tc>, window_params = [{transform_indices = @transform_0, window_bounds = array<i64: 1, 4, 16, 16>}, {transform_indices = @transform_1, window_bounds = array<i64: 1, 4, 4, 8, 8>}]} {
    %c0 = arith.constant 0 : index
    %c0_0 = arith.constant 0 : index
    %c0_1 = arith.constant 0 : index
    %c0_2 = arith.constant 0 : index
    %0 = tpu.strided_load %arg3[%c0, %c0_0, %c0_1, %c0_2] {strides = array<i32: 1, 1, 2, 2>} : memref<1x4x16x16xf32, #tpu.memory_space<vmem>>, vector<1x4x8x8xf32>
    %1 = vector.shape_cast %0 : vector<1x4x8x8xf32> to vector<4x8x8xf32>
    %c0_3 = arith.constant 0 : index
    %c0_4 = arith.constant 0 : index
    %c0_5 = arith.constant 0 : index
    %c1 = arith.constant 1 : index
    %2 = tpu.strided_load %arg3[%c0_3, %c0_4, %c0_5, %c1] {strides = array<i32: 1, 1, 2, 2>} : memref<1x4x16x16xf32, #tpu.memory_space<vmem>>, vector<1x4x8x8xf32>
    %3 = vector.shape_cast %2 : vector<1x4x8x8xf32> to vector<4x8x8xf32>
    %c0_6 = arith.constant 0 : index
    %c0_7 = arith.constant 0 : index
    %c1_8 = arith.constant 1 : index
    %c0_9 = arith.constant 0 : index
    %4 = tpu.strided_load %arg3[%c0_6, %c0_7, %c1_8, %c0_9] {strides = array<i32: 1, 1, 2, 2>} : memref<1x4x16x16xf32, #tpu.memory_space<vmem>>, vector<1x4x8x8xf32>
    %5 = vector.shape_cast %4 : vector<1x4x8x8xf32> to vector<4x8x8xf32>
    %c0_10 = arith.constant 0 : index
    %c0_11 = arith.constant 0 : index
    %c1_12 = arith.constant 1 : index
    %c1_13 = arith.constant 1 : index
    %6 = tpu.strided_load %arg3[%c0_10, %c0_11, %c1_12, %c1_13] {strides = array<i32: 1, 1, 2, 2>} : memref<1x4x16x16xf32, #tpu.memory_space<vmem>>, vector<1x4x8x8xf32>
    %7 = vector.shape_cast %6 : vector<1x4x8x8xf32> to vector<4x8x8xf32>
    %8 = arith.addf %1, %3 : vector<4x8x8xf32>
    %9 = arith.addf %5, %7 : vector<4x8x8xf32>
    %10 = arith.addf %8, %9 : vector<4x8x8xf32>
    %cst = arith.constant 5.000000e-01 : f32
    %11 = vector.broadcast %cst : f32 to vector<4x8x8xf32>
    %12 = arith.mulf %11, %10 : vector<4x8x8xf32>
    %c0_14 = arith.constant 0 : index
    %c0_15 = arith.constant 0 : index
    %c0_16 = arith.constant 0 : index
    %c0_17 = arith.constant 0 : index
    %c0_18 = arith.constant 0 : index
    %13 = vector.load %arg4[%c0_14, %c0_15, %c0_16, %c0_17, %c0_18] : memref<1x4x4x8x8xf32, #tpu.memory_space<vmem>>, vector<1x4x1x8x8xf32>
    %14 = vector.shape_cast %13 : vector<1x4x1x8x8xf32> to vector<4x8x8xf32>
    %15 = vector.shape_cast %12 : vector<4x8x8xf32> to vector<1x4x1x8x8xf32>
    tpu.vector_store %arg4[%c0_14, %c0_15, %c0_16, %c0_17, %c0_18], %15 {strides = array<i32>} : memref<1x4x4x8x8xf32, #tpu.memory_space<vmem>>, vector<1x4x1x8x8xf32>,
    %16 = arith.subf %8, %9 : vector<4x8x8xf32>
    %cst_19 = arith.constant 5.000000e-01 : f32
    %17 = vector.broadcast %cst_19 : f32 to vector<4x8x8xf32>
    %18 = arith.mulf %17, %16 : vector<4x8x8xf32>
    %c0_20 = arith.constant 0 : index
    %c0_21 = arith.constant 0 : index
    %c1_22 = arith.constant 1 : index
    %c0_23 = arith.constant 0 : index
    %c0_24 = arith.constant 0 : index
    %19 = vector.load %arg4[%c0_20, %c0_21, %c1_22, %c0_23, %c0_24] : memref<1x4x4x8x8xf32, #tpu.memory_space<vmem>>, vector<1x4x1x8x8xf32>
    %20 = vector.shape_cast %19 : vector<1x4x1x8x8xf32> to vector<4x8x8xf32>
    %21 = vector.shape_cast %18 : vector<4x8x8xf32> to vector<1x4x1x8x8xf32>
    tpu.vector_store %arg4[%c0_20, %c0_21, %c1_22, %c0_23, %c0_24], %21 {strides = array<i32>} : memref<1x4x4x8x8xf32, #tpu.memory_space<vmem>>, vector<1x4x1x8x8xf32>,
    %22 = arith.subf %1, %3 : vector<4x8x8xf32>
    %23 = arith.subf %5, %7 : vector<4x8x8xf32>
    %24 = arith.addf %22, %23 : vector<4x8x8xf32>
    %cst_25 = arith.constant 5.000000e-01 : f32
    %25 = vector.broadcast %cst_25 : f32 to vector<4x8x8xf32>
    %26 = arith.mulf %25, %24 : vector<4x8x8xf32>
    %c0_26 = arith.constant 0 : index
    %c0_27 = arith.constant 0 : index
    %c2 = arith.constant 2 : index
    %c0_28 = arith.constant 0 : index
    %c0_29 = arith.constant 0 : index
    %27 = vector.load %arg4[%c0_26, %c0_27, %c2, %c0_28, %c0_29] : memref<1x4x4x8x8xf32, #tpu.memory_space<vmem>>, vector<1x4x1x8x8xf32>
    %28 = vector.shape_cast %27 : vector<1x4x1x8x8xf32> to vector<4x8x8xf32>
    %29 = vector.shape_cast %26 : vector<4x8x8xf32> to vector<1x4x1x8x8xf32>
    tpu.vector_store %arg4[%c0_26, %c0_27, %c2, %c0_28, %c0_29], %29 {strides = array<i32>} : memref<1x4x4x8x8xf32, #tpu.memory_space<vmem>>, vector<1x4x1x8x8xf32>,
    %30 = arith.subf %22, %23 : vector<4x8x8xf32>
    %cst_30 = arith.constant 5.000000e-01 : f32
    %31 = vector.broadcast %cst_30 : f32 to vector<4x8x8xf32>
    %32 = arith.mulf %31, %30 : vector<4x8x8xf32>
    %c0_31 = arith.constant 0 : index
    %c0_32 = arith.constant 0 : index
    %c3 = arith.constant 3 : index
    %c0_33 = arith.constant 0 : index
    %c0_34 = arith.constant 0 : index
    %33 = vector.load %arg4[%c0_31, %c0_32, %c3, %c0_33, %c0_34] : memref<1x4x4x8x8xf32, #tpu.memory_space<vmem>>, vector<1x4x1x8x8xf32>
    %34 = vector.shape_cast %33 : vector<1x4x1x8x8xf32> to vector<4x8x8xf32>
    %35 = vector.shape_cast %32 : vector<4x8x8xf32> to vector<1x4x1x8x8xf32>
    tpu.vector_store %arg4[%c0_31, %c0_32, %c3, %c0_33, %c0_34], %35 {strides = array<i32>} : memref<1x4x4x8x8xf32, #tpu.memory_space<vmem>>, vector<1x4x1x8x8xf32>,
    return
  }
  func.func @transform_0(%arg0: i32, %arg1: i32, %arg2: i32) -> (i32, i32, i32, i32) {
    %c0_i32 = arith.constant 0 : i32
    %c0_i32_0 = arith.constant 0 : i32
    return %arg0, %arg1, %arg2, %c0_i32 : i32, i32, i32, i32
  }
  func.func @transform_1(%arg0: i32, %arg1: i32, %arg2: i32) -> (i32, i32, i32, i32, i32) {
    %c0_i32 = arith.constant 0 : i32
    %c0_i32_0 = arith.constant 0 : i32
    %c0_i32_1 = arith.constant 0 : i32
    return %arg0, %arg1, %c0_i32, %arg2, %c0_i32_0 : i32, i32, i32, i32, i32
  }
}

module attributes {stable_mosaic.version = 11 : i64} {
  func.func @_dwt_phase_kernel(%arg0: i32, %arg1: i32, %arg2: i32, %arg3: memref<1x4x4x8x8xf32, #tpu.memory_space<vmem>>, %arg4: memref<1x4x4x8x8xf32, #tpu.memory_space<vmem>>) attributes {dimension_semantics = [#tpu.dimension_semantics<parallel>, #tpu.dimension_semantics<parallel>, #tpu.dimension_semantics<parallel>], iteration_bounds = array<i64: 2, 1, 1>, scalar_prefetch = 0 : i64, scratch_operands = 0 : i64, tpu.core_type = #tpu.core_type<tc>, window_params = [{transform_indices = @transform_0, window_bounds = array<i64: 1, 4, 4, 8, 8>}, {transform_indices = @transform_1, window_bounds = array<i64: 1, 4, 4, 8, 8>}]} {
    %c0 = arith.constant 0 : index
    %c0_0 = arith.constant 0 : index
    %c0_1 = arith.constant 0 : index
    %c0_2 = arith.constant 0 : index
    %c0_3 = arith.constant 0 : index
    %0 = vector.load %arg3[%c0, %c0_0, %c0_1, %c0_2, %c0_3] : memref<1x4x4x8x8xf32, #tpu.memory_space<vmem>>, vector<1x4x1x8x8xf32>
    %1 = vector.shape_cast %0 : vector<1x4x1x8x8xf32> to vector<4x8x8xf32>
    %c0_4 = arith.constant 0 : index
    %c0_5 = arith.constant 0 : index
    %c1 = arith.constant 1 : index
    %c0_6 = arith.constant 0 : index
    %c0_7 = arith.constant 0 : index
    %2 = vector.load %arg3[%c0_4, %c0_5, %c1, %c0_6, %c0_7] : memref<1x4x4x8x8xf32, #tpu.memory_space<vmem>>, vector<1x4x1x8x8xf32>
    %3 = vector.shape_cast %2 : vector<1x4x1x8x8xf32> to vector<4x8x8xf32>
    %c0_8 = arith.constant 0 : index
    %c0_9 = arith.constant 0 : index
    %c2 = arith.constant 2 : index
    %c0_10 = arith.constant 0 : index
    %c0_11 = arith.constant 0 : index
    %4 = vector.load %arg3[%c0_8, %c0_9, %c2, %c0_10, %c0_11] : memref<1x4x4x8x8xf32, #tpu.memory_space<vmem>>, vector<1x4x1x8x8xf32>
    %5 = vector.shape_cast %4 : vector<1x4x1x8x8xf32> to vector<4x8x8xf32>
    %c0_12 = arith.constant 0 : index
    %c0_13 = arith.constant 0 : index
    %c3 = arith.constant 3 : index
    %c0_14 = arith.constant 0 : index
    %c0_15 = arith.constant 0 : index
    %6 = vector.load %arg3[%c0_12, %c0_13, %c3, %c0_14, %c0_15] : memref<1x4x4x8x8xf32, #tpu.memory_space<vmem>>, vector<1x4x1x8x8xf32>
    %7 = vector.shape_cast %6 : vector<1x4x1x8x8xf32> to vector<4x8x8xf32>
    %8 = arith.addf %1, %3 : vector<4x8x8xf32>
    %9 = arith.addf %5, %7 : vector<4x8x8xf32>
    %10 = arith.addf %8, %9 : vector<4x8x8xf32>
    %cst = arith.constant 5.000000e-01 : f32
    %11 = vector.broadcast %cst : f32 to vector<4x8x8xf32>
    %12 = arith.mulf %11, %10 : vector<4x8x8xf32>
    %c0_16 = arith.constant 0 : index
    %c0_17 = arith.constant 0 : index
    %c0_18 = arith.constant 0 : index
    %c0_19 = arith.constant 0 : index
    %c0_20 = arith.constant 0 : index
    %13 = vector.load %arg4[%c0_16, %c0_17, %c0_18, %c0_19, %c0_20] : memref<1x4x4x8x8xf32, #tpu.memory_space<vmem>>, vector<1x4x1x8x8xf32>
    %14 = vector.shape_cast %13 : vector<1x4x1x8x8xf32> to vector<4x8x8xf32>
    %15 = vector.shape_cast %12 : vector<4x8x8xf32> to vector<1x4x1x8x8xf32>
    tpu.vector_store %arg4[%c0_16, %c0_17, %c0_18, %c0_19, %c0_20], %15 {strides = array<i32>} : memref<1x4x4x8x8xf32, #tpu.memory_space<vmem>>, vector<1x4x1x8x8xf32>,
    %16 = arith.subf %8, %9 : vector<4x8x8xf32>
    %cst_21 = arith.constant 5.000000e-01 : f32
    %17 = vector.broadcast %cst_21 : f32 to vector<4x8x8xf32>
    %18 = arith.mulf %17, %16 : vector<4x8x8xf32>
    %c0_22 = arith.constant 0 : index
    %c0_23 = arith.constant 0 : index
    %c1_24 = arith.constant 1 : index
    %c0_25 = arith.constant 0 : index
    %c0_26 = arith.constant 0 : index
    %19 = vector.load %arg4[%c0_22, %c0_23, %c1_24, %c0_25, %c0_26] : memref<1x4x4x8x8xf32, #tpu.memory_space<vmem>>, vector<1x4x1x8x8xf32>
    %20 = vector.shape_cast %19 : vector<1x4x1x8x8xf32> to vector<4x8x8xf32>
    %21 = vector.shape_cast %18 : vector<4x8x8xf32> to vector<1x4x1x8x8xf32>
    tpu.vector_store %arg4[%c0_22, %c0_23, %c1_24, %c0_25, %c0_26], %21 {strides = array<i32>} : memref<1x4x4x8x8xf32, #tpu.memory_space<vmem>>, vector<1x4x1x8x8xf32>,
    %22 = arith.subf %1, %3 : vector<4x8x8xf32>
    %23 = arith.subf %5, %7 : vector<4x8x8xf32>
    %24 = arith.addf %22, %23 : vector<4x8x8xf32>
    %cst_27 = arith.constant 5.000000e-01 : f32
    %25 = vector.broadcast %cst_27 : f32 to vector<4x8x8xf32>
    %26 = arith.mulf %25, %24 : vector<4x8x8xf32>
    %c0_28 = arith.constant 0 : index
    %c0_29 = arith.constant 0 : index
    %c2_30 = arith.constant 2 : index
    %c0_31 = arith.constant 0 : index
    %c0_32 = arith.constant 0 : index
    %27 = vector.load %arg4[%c0_28, %c0_29, %c2_30, %c0_31, %c0_32] : memref<1x4x4x8x8xf32, #tpu.memory_space<vmem>>, vector<1x4x1x8x8xf32>
    %28 = vector.shape_cast %27 : vector<1x4x1x8x8xf32> to vector<4x8x8xf32>
    %29 = vector.shape_cast %26 : vector<4x8x8xf32> to vector<1x4x1x8x8xf32>
    tpu.vector_store %arg4[%c0_28, %c0_29, %c2_30, %c0_31, %c0_32], %29 {strides = array<i32>} : memref<1x4x4x8x8xf32, #tpu.memory_space<vmem>>, vector<1x4x1x8x8xf32>,
    %30 = arith.subf %22, %23 : vector<4x8x8xf32>
    %cst_33 = arith.constant 5.000000e-01 : f32
    %31 = vector.broadcast %cst_33 : f32 to vector<4x8x8xf32>
    %32 = arith.mulf %31, %30 : vector<4x8x8xf32>
    %c0_34 = arith.constant 0 : index
    %c0_35 = arith.constant 0 : index
    %c3_36 = arith.constant 3 : index
    %c0_37 = arith.constant 0 : index
    %c0_38 = arith.constant 0 : index
    %33 = vector.load %arg4[%c0_34, %c0_35, %c3_36, %c0_37, %c0_38] : memref<1x4x4x8x8xf32, #tpu.memory_space<vmem>>, vector<1x4x1x8x8xf32>
    %34 = vector.shape_cast %33 : vector<1x4x1x8x8xf32> to vector<4x8x8xf32>
    %35 = vector.shape_cast %32 : vector<4x8x8xf32> to vector<1x4x1x8x8xf32>
    tpu.vector_store %arg4[%c0_34, %c0_35, %c3_36, %c0_37, %c0_38], %35 {strides = array<i32>} : memref<1x4x4x8x8xf32, #tpu.memory_space<vmem>>, vector<1x4x1x8x8xf32>,
    return
  }
  func.func @transform_0(%arg0: i32, %arg1: i32, %arg2: i32) -> (i32, i32, i32, i32, i32) {
    %c0_i32 = arith.constant 0 : i32
    %c0_i32_0 = arith.constant 0 : i32
    %c0_i32_1 = arith.constant 0 : i32
    return %arg0, %arg1, %c0_i32, %arg2, %c0_i32_0 : i32, i32, i32, i32, i32
  }
  func.func @transform_1(%arg0: i32, %arg1: i32, %arg2: i32) -> (i32, i32, i32, i32, i32) {
    %c0_i32 = arith.constant 0 : i32
    %c0_i32_0 = arith.constant 0 : i32
    %c0_i32_1 = arith.constant 0 : i32
    return %arg0, %arg1, %c0_i32, %arg2, %c0_i32_0 : i32, i32, i32, i32, i32
  }
}

</mosaic_0001>

<bundles_post_ra>
// kernel: tpu_custom_call.1
= control target key start
LH: loop header
LB: loop body
LE: loop exit
PB: predicated region body
PF: predicated region fallthrough
CT: control target
= control target key end

     0   :  { %6 = vsyncpa [#allocation3], 0  ;;  %s838_s0 = inlined_call_operand.hbm [shape: f32[2,4,4,8,8], index: 0, kind: input, shape index: {}]   ;;  %s839_s1 = inlined_call_operand.hbm [shape: f32[2,4,4,8,8], index: 1, kind: output, shape index: {}]  }
   0x1   :  { %8 = vsyncpa [#allocation3 + $0x1], 0 }
   0x2   :  { %9 = vsyncpa [#allocation4], 0 }
   0x3   :  { %11 = vsyncpa [#allocation4 + $0x1], 0  ;;  %s602_s6 = smov 0   ;;  %s604_s7 = smov 0  }
   0x4   :  { %s606_s8 = smov 0   ;;  %s608_s9 = smov 0  }
   0x5   :  { %s610_s10 = smov 0   ;;  %s612_s11 = smov 0  }
   0x6 LB: > { %s365_s12 = sadd.s32 4294967295, %s584_s11   ;;  %s366_s13 = sadd.s32 4294967294, %s584_s11   ;;  %s584_s11 = sphi %s612_s11, %s17_s11   ;;  %s580_s10 = sphi %s610_s10, %s854_s10   ;;  %s576_s9 = sphi %s608_s9, %s853_s9   ;;  %s572_s8 = sphi %s606_s8, %s852_s8   ;;  %s568_s7 = sphi %s604_s7, %s851_s7   ;;  %s564_s6 = sphi %s602_s6, %s850_s6  }
   0x7   : > { %s36_s14 = sadd.s32 1, %s580_s10  ;;  %s47_s15 = sadd.s32 1, %s572_s8 }
   0x8   : > { %p38_p0 = scmp.ge.s32.totalorder %s36_s14, 2  ;;  %p54_p1 = scmp.ne.s32.totalorder %s572_s8, %s568_s7 }
   0x9   : > { %p55_p2 = scmp.eq.s32.totalorder %s584_s11, 0  ;;  %p60_p3 = scmp.ne.s32.totalorder %s568_s7, %s564_s6 }
   0xa   : > { %s856_s14 = smov (%p38_p0, %s36_s14), 0  ;;  %p61_p5 = scmp.eq.s32.totalorder %s365_s12, 0 }
   0xb   : > { %p643_p4 = por %p55_p2, %p54_p1  ;;  %s40_s17 = ssub.s32 %s580_s10, %s856_s14 }
   0xc   : > { %p88_p6 = scmp.eq.s32.totalorder %s365_s12, 1  ;;  %p45_p7 = scmp.eq.s32.totalorder %s40_s17, 0 }
   0xd   : > { %p649_p8 = por %p61_p5, %p60_p3  ;;  %p94_p10 = scmp.eq.s32.totalorder %s366_s13, 1 }
   0xe   : > { %p653_p9 = por %p88_p6, %p54_p1  ;;  %p418_p13 = scmp.lt.s32.totalorder %s584_s11, 2 }
   0xf   : > { %s658_s20 = scalar_select %p45_p7, %s572_s8, %s47_s15  }
  0x10   : > { %s843_s19 = scalar_select %p653_p9, 1, 0 }
  0x11   : > { %p660_p11 = por %p94_p10, %p60_p3  ;;  %s114_s22 = sand.u32 1, %s572_s8  }
  0x12   : > { %s369_s23 = sshll.u32 %s114_s22, 7  ;;  %s404_s24 = sshll.u32 %s580_s10, 11 }
  0x13   : > { %s844_s21 = scalar_select %p660_p11, 1, 0 }
  0x14   : > { %s671_s27 = scalar_lea.hbm %s838_s0, %s404_s24  ;;  %s118_s28 = scalar_lea.vmem [#allocation2], %s369_s23 }
  0x15   : > { %s129_s29 = sshll.u32 %s118_s28, 4  ;;  %p677_p0 = pnand %p418_p13, %p643_p4  ;;  %s673_s29 = int_to_ptr.vmem [resolvable:$true] %s129_s29 }
  0x16   : > { %s682_s2 = scalar_lea.sflag [#allocation3], %s114_s22  ;;  %s472_s3 = scalar_lea.hbm %s671_s27, 2048 }
  0x17   : > { %p473_p2 = scmp.ne.s32.totalorder %s671_s27, %s472_s3  ;;  %p474_p3 = pneg %p677_p0 }
  0x18   : > { %s477_s12 = scalar_lea.hbm %s838_s0, 4096  ;;  %p478_p4 = scmp.lt.u32.totalorder %s671_s27, %s838_s0 }
  0x19   : > { %p475_p5 = pnand %p474_p3, %p473_p2  ;;  %p479_p7 = scmp.lt.u32.totalorder %s477_s12, %s472_s3 }
  0x1a   : > { %p481_p13 = scmp.lt.u32.totalorder %s472_s3, %s671_s27 }
  0x1b   : > { %p476_p6 = pneg %p475_p5  ;;  %p480_p10 = por %p479_p7, %p478_p4 }
  0x1d   : > { %p482_p12 = por %p481_p13, %p480_p10 }
  0x1f   : > { %p483_p1 = pnand %p482_p12, %p476_p6 }
  0x21   : > { %486 = shalt.err (!%p483_p1)
}
  0x22   : > { %s487_s16 = scalar_lea.vmem %s673_s29, 2048  ;;  %s586_s17 = smov [#allocation2]  }
  0x23   : > { %p488_p2 = scmp.ne.s32.totalorder %s673_s29, %s487_s16  ;;  %s492_s22 = sshll.u32 %s586_s17, 4  ;;  %s493_s22 = int_to_ptr.vmem [resolvable:$false] %s492_s22 }
  0x24   : > { %s494_s23 = scalar_lea.vmem %s493_s22, 4096  ;;  %p495_p9 = scmp.lt.s32.totalorder %s673_s29, %s493_s22 }
  0x25   : > { %p490_p5 = pnand %p488_p2, %p474_p3  ;;  %p496_p4 = scmp.lt.s32.totalorder %s494_s23, %s487_s16 }
  0x27   : > { %p491_p11 = pneg %p490_p5  ;;  %p497_p7 = por %p496_p4, %p495_p9 }
  0x29   : > { %p498_p10 = pnand %p497_p7, %p491_p11 }
  0x2b   : > { %501 = shalt.err (!%p498_p10)
}
  0x2c   : > { %s587_s24 = smov 128   ;;  %s588_s25 = smov 8  }
  0x2d   : > { %413 = dma.hbm_to_vmem [thread:$0]  (!%p677_p0), %s671_s27, 2048, %s673_s29, %s682_s2, %s587_s24, %s587_s24, %s588_s25  }
  0x2e   : > { %p137_p12 = scmp.lt.s32.totalorder %s584_s11, 3  ;;  %p846_p1 = scmp.ge.s32.totalorder %s584_s11, 1 }
  0x30   : > { %p138_p3 = pnand %p846_p1, %p137_p12 }
  0x31   : > { %s714_s26 = sand.u32 (!%p138_p3), 1, %s568_s7  }
  0x32   : > { %141 = sbr.rel (%p138_p3) target bundleno = 90 (0x5a), region = 24  ;;  %s373_s28 = sshll.u32 (!%p138_p3), %s714_s26, 7 }
  0x33   : > { %s144_s3 = scalar_lea.sflag (!%p138_p3), [#allocation3], %s714_s26  ;;  %s720_s4 = scalar_lea.vmem (!%p138_p3), [#allocation2], %s373_s28 }
  0x39   : > { %555 = dma.done.wait (%p649_p8), %s144_s3, 2048  }
  0x3a   : > { %557 = vsyncadd (%p649_p8), %s144_s3, 4294965248  ;;  %v168_v0 = vld [vmem:[%s720_s4] sm:$0xff]  ;;  %v375_v1 = vld [vmem:[%s720_s4 + $0x8] sm:$0xff]  ;;  %vm203_vm0 = vcmask 64512   ;;  %s747_s18 = scalar_lea.vmem [#allocation5], %s373_s28  ;;  %s405_s27 = sshll.u32 %s576_s9, 11 }
  0x3b   : > { %v379_v2 = vld [vmem:[%s720_s4 + $0x10] sm:$0xff]  ;;  %v383_v3 = vld [vmem:[%s720_s4 + $0x18] sm:$0xff]  ;;  %v187_v4 = vadd.f32 %v375_v1, %v168_v0  ;;  %v169_v5 = vld [vmem:[%s720_s4 + $0x20] sm:$0xff]  ;;  %v732_v7 = vsub.f32 %v168_v0, %v375_v1  ;;  %s273_s29 = sshll.u32 %s747_s18, 4  ;;  %s775_s2 = scalar_lea.hbm %s839_s1, %s405_s27  ;;  %s777_s29 = int_to_ptr.vmem [resolvable:$true] %s273_s29 }
  0x3c   : > { %v376_v6 = vld [vmem:[%s720_s4 + $0x28] sm:$0xff]  ;;  %v191_v8 = vadd.f32 %v383_v3, %v379_v2  ;;  %v380_v9 = vld [vmem:[%s720_s4 + $0x30] sm:$0xff]  ;;  %v384_v10 = vld [vmem:[%s720_s4 + $0x38] sm:$0xff]  ;;  %v225_v13 = vsub.f32 %v379_v2, %v383_v3  ;;  %s256_s5 = scalar_lea.sflag [#allocation4], %s714_s26  ;;  %s502_s12 = scalar_lea.vmem %s777_s29, 2048 }
  0x3d   : > { %v188_v11 = vadd.f32 %v376_v6, %v169_v5  ;;  %v170_v12 = vld [vmem:[%s720_s4 + $0x40] sm:$0xff]  ;;  %v192_v14 = vadd.f32 %v384_v10, %v380_v9  ;;  %v377_v15 = vld [vmem:[%s720_s4 + $0x48] sm:$0xff]  ;;  %v381_v16 = vld [vmem:[%s720_s4 + $0x50] sm:$0xff]  ;;  %v222_v18 = vsub.f32 %v169_v5, %v376_v6  ;;  %v226_v19 = vsub.f32 %v380_v9, %v384_v10  ;;  %p503_p8 = scmp.ne.s32.totalorder %s777_s29, %s502_s12  ;;  %p847_p9 = scmp.ne.s32.totalorder %s843_s19, 0 }
  0x3e   : > { %v385_v17 = vld [vmem:[%s720_s4 + $0x58] sm:$0xff]  ;;  %v195_v20 = vadd.f32 %v191_v8, %v187_v4  ;;  %v189_v21 = vadd.f32 %v377_v15, %v170_v12  ;;  %v171_v23 = vld [vmem:[%s720_s4 + $0x60] sm:$0xff]  ;;  %v378_v24 = vld [vmem:[%s720_s4 + $0x68] sm:$0xff]  ;;  %v208_v26 = vsub.f32 %v187_v4, %v191_v8  ;;  %v229_v31 = vadd.f32 %v225_v13, %v732_v7  ;;  %s589_s13 = smov [#allocation5]  }
  0x3f   : > { %v193_v22 = vadd.f32 %v385_v17, %v381_v16  ;;  %v382_v25 = vld [vmem:[%s720_s4 + $0x70] sm:$0xff]  ;;  %v196_v27 = vadd.f32 %v192_v14, %v188_v11  ;;  %v386_v28 = vld [vmem:[%s720_s4 + $0x78] sm:$0xff]  ;;  %v190_v29 = vadd.f32 %v378_v24, %v171_v23  ;;  %v209_v30 = vsub.f32 %v188_v11, %v192_v14  ;;  %p504_p11 = pnand %p503_p8, %p847_p9  ;;  %s506_s15 = sshll.u32 %s589_s13, 4  ;;  %s507_s15 = int_to_ptr.vmem [resolvable:$false] %s506_s15 }
  0x40   : > { %v199_v32 = vmul.f32 0.5, %v195_v20  ;;  %v194_v34 = vadd.f32 %v386_v28, %v382_v25  ;;  %v212_v35 = vmul.f32 0.5, %v208_v26  ;;  %v233_v39 = vmul.f32 0.5, %v229_v31  ;;  %s508_s16 = scalar_lea.vmem %s507_s15, 4096  ;;  %p509_p6 = scmp.lt.s32.totalorder %s777_s29, %s507_s15 }
  0x41   : > { %v197_v33 = vadd.f32 %v193_v22, %v189_v21  ;;  %v200_v36 = vmul.f32 0.5, %v196_v27  ;;  %v213_v37 = vmul.f32 0.5, %v209_v30  ;;  %v210_v38 = vsub.f32 %v189_v21, %v193_v22  ;;  %p505_p0 = pneg %p504_p11  ;;  %p510_p13 = scmp.lt.s32.totalorder %s508_s16, %s502_s12 }
  0x42   : > { %204 = vst.msk [vmem:[%s747_s18] sm:$0xff] %vm203_vm0, %v199_v32  ;;  %v198_v41 = vadd.f32 %v194_v34, %v190_v29  ;;  %387 = vst.msk [vmem:[%s747_s18 + $0x8] sm:$0xff] %vm203_vm0, %v212_v35  ;;  %v211_v42 = vsub.f32 %v190_v29, %v194_v34  ;;  %v230_v43 = vadd.f32 %v226_v19, %v222_v18 }
  0x43   : > { %v201_v40 = vmul.f32 0.5, %v197_v33  ;;  %205 = vst.msk [vmem:[%s747_s18 + $0x20] sm:$0xff] %vm203_vm0, %v200_v36  ;;  %388 = vst.msk [vmem:[%s747_s18 + $0x28] sm:$0xff] %vm203_vm0, %v213_v37  ;;  %v214_v44 = vmul.f32 0.5, %v210_v38  ;;  %v223_v45 = vsub.f32 %v170_v12, %v377_v15  ;;  %v227_v46 = vsub.f32 %v381_v16, %v385_v17  ;;  %p511_p2 = por %p510_p13, %p509_p6 }
  0x44   : > { %391 = vst.msk [vmem:[%s747_s18 + $0x10] sm:$0xff] %vm203_vm0, %v233_v39  ;;  %v224_v47 = vsub.f32 %v171_v23, %v378_v24  ;;  %v202_v48 = vmul.f32 0.5, %v198_v41  ;;  %v215_v49 = vmul.f32 0.5, %v211_v42  ;;  %v234_v50 = vmul.f32 0.5, %v230_v43 }
  0x45   : > { %206 = vst.msk [vmem:[%s747_s18 + $0x40] sm:$0xff] %vm203_vm0, %v201_v40  ;;  %v228_v51 = vsub.f32 %v382_v25, %v386_v28  ;;  %389 = vst.msk [vmem:[%s747_s18 + $0x48] sm:$0xff] %vm203_vm0, %v214_v44  ;;  %v231_v52 = vadd.f32 %v227_v46, %v223_v45  ;;  %v242_v53 = vsub.f32 %v732_v7, %v225_v13  ;;  %p512_p5 = pnand %p511_p2, %p505_p0 }
  0x46   : > { %v243_v54 = vsub.f32 %v222_v18, %v226_v19  ;;  %v244_v55 = vsub.f32 %v223_v45, %v227_v46  ;;  %207 = vst.msk [vmem:[%s747_s18 + $0x60] sm:$0xff] %vm203_vm0, %v202_v48  ;;  %390 = vst.msk [vmem:[%s747_s18 + $0x68] sm:$0xff] %vm203_vm0, %v215_v49 }
  0x47   : > { %392 = vst.msk [vmem:[%s747_s18 + $0x30] sm:$0xff] %vm203_vm0, %v234_v50  ;;  %v232_v56 = vadd.f32 %v228_v51, %v224_v47  ;;  %v245_v57 = vsub.f32 %v224_v47, %v228_v51  ;;  %v235_v58 = vmul.f32 0.5, %v231_v52  ;;  %v246_v59 = vmul.f32 0.5, %v242_v53 }
  0x48   : > { %v247_v60 = vmul.f32 0.5, %v243_v54  ;;  %v248_v61 = vmul.f32 0.5, %v244_v55 }
  0x49   : > { %v236_v62 = vmul.f32 0.5, %v232_v56  ;;  %v249_v63 = vmul.f32 0.5, %v245_v57  ;;  %393 = vst.msk [vmem:[%s747_s18 + $0x50] sm:$0xff] %vm203_vm0, %v235_v58  ;;  %395 = vst.msk [vmem:[%s747_s18 + $0x18] sm:$0xff] %vm203_vm0, %v246_v59 }
  0x4a   : > { %396 = vst.msk [vmem:[%s747_s18 + $0x38] sm:$0xff] %vm203_vm0, %v247_v60  ;;  %397 = vst.msk [vmem:[%s747_s18 + $0x58] sm:$0xff] %vm203_vm0, %v248_v61 }
  0x4b   : > { %394 = vst.msk [vmem:[%s747_s18 + $0x70] sm:$0xff] %vm203_vm0, %v236_v62  ;;  %398 = vst.msk [vmem:[%s747_s18 + $0x78] sm:$0xff] %vm203_vm0, %v249_v63 }
  0x4c   : > { %515 = shalt.err (!%p512_p5)
}
  0x4d   : > { %s516_s17 = scalar_lea.hbm %s775_s2, 2048  ;;  %s520_s24 = scalar_lea.hbm %s839_s1, 4096 }
  0x4e   : > { %p517_p4 = scmp.ne.s32.totalorder %s775_s2, %s516_s17  ;;  %p521_p12 = scmp.lt.u32.totalorder %s775_s2, %s839_s1 }
  0x4f   : > { %p522_p1 = scmp.lt.u32.totalorder %s520_s24, %s516_s17  ;;  %p524_p8 = scmp.lt.u32.totalorder %s516_s17, %s775_s2 }
  0x50   : > { %p518_p7 = pnand %p517_p4, %p847_p9 }
  0x51   : > { %p523_p3 = por %p522_p1, %p521_p12 }
  0x52   : > { %p519_p10 = pneg %p518_p7 }
  0x53   : > { %p525_p11 = por %p524_p8, %p523_p3 }
  0x55   : > { %p526_p0 = pnand %p525_p11, %p519_p10 }
  0x57   : > { %529 = shalt.err (!%p526_p0)
}
  0x58   : > { %s590_s3 = smov 128   ;;  %s591_s4 = smov 8  }
  0x59   : > { %408 = dma.vmem_to_hbm [thread:$0]  (%p847_p9), %s777_s29, 2048, %s775_s2, %s256_s5, %s590_s3, %s590_s3, %s591_s4  }
  0x5a PF: > { %s288_s18 = sand.u32 1, %s564_s6   ;;  %p848_p6 = scmp.ne.s32.totalorder %s844_s21, 0 }
  0x5b   : > { %p849_p13 = scmp.ge.s32.totalorder %s584_s11, 2  ;;  %s289_s27 = scalar_lea.sflag [#allocation4], %s288_s18 }
  0x5d   : > { %p415_p2 = pnand %p849_p13, %p848_p6 }
  0x5f   : > { %559 = dma.done.wait (!%p415_p2), %s289_s27, 2048  }
  0x60   : > { %561 = vsyncadd (!%p415_p2), %s289_s27, 4294965248  ;;  %s17_s11 = sadd.s32 1, %s584_s11   ;;  %s850_s6 = smov %s568_s7 }
  0x61   : > { %p14_p5 = scmp.ge.s32.totalorder %s17_s11, 4   ;;  %s851_s7 = smov %s572_s8 }
  0x62   : > { %s852_s8 = smov %s658_s20  ;;  %s853_s9 = smov %s580_s10 }
  0x63   : > { %s854_s10 = smov %s856_s14  ;;  %16 = sbr.rel (!%p14_p5) target bundleno = 6 (0x6), region = 75 }
  0x6a   :  { %294 = vsyncpa [#allocation3], 1 }
  0x6b   :  { %296 = vsyncpa [#allocation3 + $0x1], 1 }
  0x6c   :  { %297 = vsyncpa [#allocation4], 1 }
  0x6d   :  { %299 = vsyncpa [#allocation4 + $0x1], 1 }

</bundles_post_ra>
